<compile_context>
chip_gen: v7x
topology: tpu7x:2x2x1
jax: 0.10.0
libtpu: 0.0.40
codegen_flags: <defaults>
</compile_context>

<pallas_src>
import functools

import jax
import jax.numpy as jnp
from jax.experimental import pallas as pl
from jax.experimental.pallas import tpu as pltpu

LANE = 128        # TPU lane width: all hidden / output feature dims are padded to this
N_LAYERS = 5      # 6 Linear layers, with the activation-free pair (L3,L4) folded into one


def autoencoder_kernel(x_ref, w1_ref, w_ref, b_ref, o_ref):
    """Full forward for one batch tile, all operands resident in VMEM.

    x_ref : (tile, D)                  input tile (streamed over the batch)
    w1_ref: (D, LANE)                  layer-1 weight (resident)
    w_ref : (N_LAYERS-1, LANE, LANE)   layers 2..N weights, zero-padded (resident)
    b_ref : (N_LAYERS, 1, LANE)        all biases, zero-padded (resident)
    o_ref : (tile, LANE)               lane-dense padded output tile
    """
    # Layer 1 (D -> 64, padded to LANE) + ReLU.
    h = jnp.dot(x_ref[...], w1_ref[...], preferred_element_type=jnp.float32) + b_ref[0]
    h = jnp.maximum(h, 0.0)

    # Layers 2..4 (64->32, folded 32->32, 32->64; all padded to LANE) + ReLU.
    # Static Python loop -> fully unrolled, static first-axis indexing of the slabs.
    for l in range(N_LAYERS - 2):
        h = jnp.dot(h, w_ref[l], preferred_element_type=jnp.float32) + b_ref[l + 1]
        h = jnp.maximum(h, 0.0)

    # Final layer (64 -> D, padded to LANE) + Sigmoid.
    # Padded output lanes see sigmoid(0) = 0.5 and are sliced away in the wrapper.
    h = jnp.dot(h, w_ref[N_LAYERS - 2], preferred_element_type=jnp.float32) + b_ref[N_LAYERS - 1]
    o_ref[...] = (1.0 / (1.0 + jnp.exp(-h))).astype(o_ref.dtype)


def _round_up(x, m):
    return ((x + m - 1) // m) * m


def _pad_to(a, shape):
    out = jnp.zeros(shape, a.dtype)
    return out.at[tuple(slice(0, s) for s in a.shape)].set(a)


def pack_params(params):
    """Fold layers 3&4 (no activation between them) and pack into 3 lane-padded arrays."""
    hi = jax.lax.Precision.HIGHEST
    w34 = jnp.dot(params["w3"], params["w4"], precision=hi)                  # (32, 32)
    b34 = jnp.dot(params["b3"], params["w4"], precision=hi) + params["b4"]   # (1, 32)

    w1 = params["w1"]
    d = w1.shape[0]
    w1p = _pad_to(w1, (d, LANE))                                             # (D, 128)
    w_stack = jnp.stack([_pad_to(w, (LANE, LANE))
                         for w in (params["w2"], w34, params["w5"], params["w6"])])
    b_stack = jnp.stack([_pad_to(b, (1, LANE))
                         for b in (params["b1"], params["b2"], b34,
                                   params["b5"], params["b6"])])
    return w1p, w_stack, b_stack


@functools.partial(jax.jit, static_argnames=("batch_tile",))
def autoencoder_forward(x, w1p, w_stack, b_stack, *, batch_tile=512):
    """x: (B, D) float32. Packed params from pack_params(). Returns (B, D)."""
    B, D = x.shape
    assert w1p.shape[0] == D

    tile = _round_up(min(batch_tile, _round_up(B, 8)), 8)
    B_pad = _round_up(B, tile)
    if B_pad != B:
        x = jnp.pad(x, ((0, B_pad - B), (0, 0)))
    grid = (B_pad // tile,)

    out = pl.pallas_call(
        autoencoder_kernel,
        out_shape=jax.ShapeDtypeStruct((B_pad, LANE), x.dtype),
        grid_spec=pltpu.PrefetchScalarGridSpec(
            num_scalar_prefetch=0,
            grid=grid,
            in_specs=[
                pl.BlockSpec((tile, D), lambda i: (i, 0)),                      # x: streamed
                pl.BlockSpec((D, LANE), lambda i: (0, 0)),                      # w1: resident
                pl.BlockSpec((N_LAYERS - 1, LANE, LANE), lambda i: (0, 0, 0)),  # W slab: resident
                pl.BlockSpec((N_LAYERS, 1, LANE), lambda i: (0, 0, 0)),         # b slab: resident
            ],
            out_specs=pl.BlockSpec((tile, LANE), lambda i: (i, 0)),             # lane-dense stores
        ),
        compiler_params=pltpu.CompilerParams(
            dimension_semantics=("parallel",)),                                 # shard grid across TCs
    )(x, w1p, w_stack, b_stack)

    return out[:B, :D]


def init_params(key, input_dim):
    """Deterministic synthetic params. Linear(in, out) stored as W:(in,out), b:(1,out)."""
    dims = [(input_dim, 64), (64, 32), (32, 16),      # encoder
            (16, 32), (32, 64), (64, input_dim)]      # decoder
    params = {}
    for idx, (din, dout) in enumerate(dims, start=1):
        key, kw, kb = jax.random.split(key, 3)
        bound = 1.0 / jnp.sqrt(din)                   # PyTorch-style uniform init bound
        params[f"w{idx}"] = jax.random.uniform(
            kw, (din, dout), jnp.float32, -bound, bound)
        params[f"b{idx}"] = jax.random.uniform(
            kb, (1, dout), jnp.float32, -bound, bound)
    return params


def reference_forward(x, params):
    """Plain-JAX reference matching the PyTorch module exactly (6 unfolded layers)."""
    h = jnp.maximum(x @ params["w1"] + params["b1"], 0.0)
    h = jnp.maximum(h @ params["w2"] + params["b2"], 0.0)
    h = h @ params["w3"] + params["b3"]                       # no activation after encoder out
    h = jnp.maximum(h @ params["w4"] + params["b4"], 0.0)
    h = jnp.maximum(h @ params["w5"] + params["b5"], 0.0)
    h = h @ params["w6"] + params["b6"]
    return jax.nn.sigmoid(h)


if __name__ == "__main__":
    key = jax.random.PRNGKey(0)
    input_dim = 20      # X_train.shape[1] in the original script (tabular features)
    batch = 256

    key, kx, kp = jax.random.split(key, 3)
    x = jax.random.normal(kx, (batch, input_dim), dtype=jnp.float32)
    params = init_params(kp, input_dim)
    w1p, w_stack, b_stack = pack_params(params)

    # batch_tile=128 -> 2 grid steps (exercises the pipeline / megacore sharding).
    out = autoencoder_forward(x, w1p, w_stack, b_stack, batch_tile=128)
    out = jax.block_until_ready(out)

    ref = reference_forward(x, params)
    assert out.shape == (batch, input_dim)
    assert jnp.allclose(out, ref, atol=1e-4, rtol=1e-4), "mismatch vs reference"

    print("KERNEL_OK")
</pallas_src>

<mosaic_0001>
module attributes {stable_mosaic.version = 11 : i64} {
  func.func @autoencoder_kernel(%arg0: i32, %arg1: memref<128x20xf32, #tpu.memory_space<vmem>>, %arg2: memref<20x128xf32, #tpu.memory_space<vmem>>, %arg3: memref<4x128x128xf32, #tpu.memory_space<vmem>>, %arg4: memref<5x1x128xf32, #tpu.memory_space<vmem>>, %arg5: memref<128x128xf32, #tpu.memory_space<vmem>>) attributes {dimension_semantics = [#tpu.dimension_semantics<parallel>], iteration_bounds = array<i64: 2>, scalar_prefetch = 0 : i64, scratch_operands = 0 : i64, tpu.core_type = #tpu.core_type<tc>, window_params = [{transform_indices = @transform_0, window_bounds = array<i64: 128, 20>}, {pipeline_mode = #tpu.pipeline_mode<synchronous>, transform_indices = @transform_1, window_bounds = array<i64: 20, 128>}, {pipeline_mode = #tpu.pipeline_mode<synchronous>, transform_indices = @transform_2, window_bounds = array<i64: 4, 128, 128>}, {pipeline_mode = #tpu.pipeline_mode<synchronous>, transform_indices = @transform_3, window_bounds = array<i64: 5, 1, 128>}, {transform_indices = @transform_4, window_bounds = array<i64: 128, 128>}]} {
    %c0 = arith.constant 0 : index
    %c0_0 = arith.constant 0 : index
    %0 = vector.load %arg1[%c0, %c0_0] : memref<128x20xf32, #tpu.memory_space<vmem>>, vector<128x20xf32>
    %c0_1 = arith.constant 0 : index
    %c0_2 = arith.constant 0 : index
    %1 = vector.load %arg2[%c0_1, %c0_2] : memref<20x128xf32, #tpu.memory_space<vmem>>, vector<20x128xf32>
    %cst = arith.constant dense<0.000000e+00> : vector<128x128xf32>
    %2 = tpu.matmul %0, %1, %cst {dimension_numbers = #tpu.dot_dimension_numbers<[1], [0], [0], [1], [0, 0, 1, 1], [], []>} : vector<128x20xf32>, vector<20x128xf32>, vector<128x128xf32> -> vector<128x128xf32>
    %c0_3 = arith.constant 0 : index
    %c0_4 = arith.constant 0 : index
    %c0_5 = arith.constant 0 : index
    %3 = vector.load %arg4[%c0_3, %c0_4, %c0_5] : memref<5x1x128xf32, #tpu.memory_space<vmem>>, vector<1x1x128xf32>
    %4 = vector.shape_cast %3 : vector<1x1x128xf32> to vector<1x128xf32>
    %5 = vector.broadcast %4 : vector<1x128xf32> to vector<128x128xf32>
    %6 = arith.addf %2, %5 : vector<128x128xf32>
    %cst_6 = arith.constant 0.000000e+00 : f32
    %7 = vector.broadcast %cst_6 : f32 to vector<128x128xf32>
    %8 = arith.maximumf %6, %7 : vector<128x128xf32>
    %c0_7 = arith.constant 0 : index
    %c0_8 = arith.constant 0 : index
    %c0_9 = arith.constant 0 : index
    %9 = vector.load %arg3[%c0_7, %c0_8, %c0_9] : memref<4x128x128xf32, #tpu.memory_space<vmem>>, vector<1x128x128xf32>
    %10 = vector.shape_cast %9 : vector<1x128x128xf32> to vector<128x128xf32>
    %cst_10 = arith.constant dense<0.000000e+00> : vector<128x128xf32>
    %11 = tpu.matmul %8, %10, %cst_10 {dimension_numbers = #tpu.dot_dimension_numbers<[1], [0], [0], [1], [0, 0, 1, 1], [], []>} : vector<128x128xf32>, vector<128x128xf32>, vector<128x128xf32> -> vector<128x128xf32>
    %c1 = arith.constant 1 : index
    %c0_11 = arith.constant 0 : index
    %c0_12 = arith.constant 0 : index
    %12 = vector.load %arg4[%c1, %c0_11, %c0_12] : memref<5x1x128xf32, #tpu.memory_space<vmem>>, vector<1x1x128xf32>
    %13 = vector.shape_cast %12 : vector<1x1x128xf32> to vector<1x128xf32>
    %14 = vector.broadcast %13 : vector<1x128xf32> to vector<128x128xf32>
    %15 = arith.addf %11, %14 : vector<128x128xf32>
    %cst_13 = arith.constant 0.000000e+00 : f32
    %16 = vector.broadcast %cst_13 : f32 to vector<128x128xf32>
    %17 = arith.maximumf %15, %16 : vector<128x128xf32>
    %c1_14 = arith.constant 1 : index
    %c0_15 = arith.constant 0 : index
    %c0_16 = arith.constant 0 : index
    %18 = vector.load %arg3[%c1_14, %c0_15, %c0_16] : memref<4x128x128xf32, #tpu.memory_space<vmem>>, vector<1x128x128xf32>
    %19 = vector.shape_cast %18 : vector<1x128x128xf32> to vector<128x128xf32>
    %cst_17 = arith.constant dense<0.000000e+00> : vector<128x128xf32>
    %20 = tpu.matmul %17, %19, %cst_17 {dimension_numbers = #tpu.dot_dimension_numbers<[1], [0], [0], [1], [0, 0, 1, 1], [], []>} : vector<128x128xf32>, vector<128x128xf32>, vector<128x128xf32> -> vector<128x128xf32>
    %c2 = arith.constant 2 : index
    %c0_18 = arith.constant 0 : index
    %c0_19 = arith.constant 0 : index
    %21 = vector.load %arg4[%c2, %c0_18, %c0_19] : memref<5x1x128xf32, #tpu.memory_space<vmem>>, vector<1x1x128xf32>
    %22 = vector.shape_cast %21 : vector<1x1x128xf32> to vector<1x128xf32>
    %23 = vector.broadcast %22 : vector<1x128xf32> to vector<128x128xf32>
    %24 = arith.addf %20, %23 : vector<128x128xf32>
    %cst_20 = arith.constant 0.000000e+00 : f32
    %25 = vector.broadcast %cst_20 : f32 to vector<128x128xf32>
    %26 = arith.maximumf %24, %25 : vector<128x128xf32>
    %c2_21 = arith.constant 2 : index
    %c0_22 = arith.constant 0 : index
    %c0_23 = arith.constant 0 : index
    %27 = vector.load %arg3[%c2_21, %c0_22, %c0_23] : memref<4x128x128xf32, #tpu.memory_space<vmem>>, vector<1x128x128xf32>
    %28 = vector.shape_cast %27 : vector<1x128x128xf32> to vector<128x128xf32>
    %cst_24 = arith.constant dense<0.000000e+00> : vector<128x128xf32>
    %29 = tpu.matmul %26, %28, %cst_24 {dimension_numbers = #tpu.dot_dimension_numbers<[1], [0], [0], [1], [0, 0, 1, 1], [], []>} : vector<128x128xf32>, vector<128x128xf32>, vector<128x128xf32> -> vector<128x128xf32>
    %c3 = arith.constant 3 : index
    %c0_25 = arith.constant 0 : index
    %c0_26 = arith.constant 0 : index
    %30 = vector.load %arg4[%c3, %c0_25, %c0_26] : memref<5x1x128xf32, #tpu.memory_space<vmem>>, vector<1x1x128xf32>
    %31 = vector.shape_cast %30 : vector<1x1x128xf32> to vector<1x128xf32>
    %32 = vector.broadcast %31 : vector<1x128xf32> to vector<128x128xf32>
    %33 = arith.addf %29, %32 : vector<128x128xf32>
    %cst_27 = arith.constant 0.000000e+00 : f32
    %34 = vector.broadcast %cst_27 : f32 to vector<128x128xf32>
    %35 = arith.maximumf %33, %34 : vector<128x128xf32>
    %c3_28 = arith.constant 3 : index
    %c0_29 = arith.constant 0 : index
    %c0_30 = arith.constant 0 : index
    %36 = vector.load %arg3[%c3_28, %c0_29, %c0_30] : memref<4x128x128xf32, #tpu.memory_space<vmem>>, vector<1x128x128xf32>
    %37 = vector.shape_cast %36 : vector<1x128x128xf32> to vector<128x128xf32>
    %cst_31 = arith.constant dense<0.000000e+00> : vector<128x128xf32>
    %38 = tpu.matmul %35, %37, %cst_31 {dimension_numbers = #tpu.dot_dimension_numbers<[1], [0], [0], [1], [0, 0, 1, 1], [], []>} : vector<128x128xf32>, vector<128x128xf32>, vector<128x128xf32> -> vector<128x128xf32>
    %c4 = arith.constant 4 : index
    %c0_32 = arith.constant 0 : index
    %c0_33 = arith.constant 0 : index
    %39 = vector.load %arg4[%c4, %c0_32, %c0_33] : memref<5x1x128xf32, #tpu.memory_space<vmem>>, vector<1x1x128xf32>
    %40 = vector.shape_cast %39 : vector<1x1x128xf32> to vector<1x128xf32>
    %41 = vector.broadcast %40 : vector<1x128xf32> to vector<128x128xf32>
    %42 = arith.addf %38, %41 : vector<128x128xf32>
    %cst_34 = arith.constant 0.000000e+00 : f32
    %43 = vector.broadcast %cst_34 : f32 to vector<128x128xf32>
    %44 = arith.subf %43, %42 : vector<128x128xf32>
    %45 = math.exp %44 : vector<128x128xf32>
    %cst_35 = arith.constant 1.000000e+00 : f32
    %46 = vector.broadcast %cst_35 : f32 to vector<128x128xf32>
    %47 = arith.addf %46, %45 : vector<128x128xf32>
    %cst_36 = arith.constant 1.000000e+00 : f32
    %48 = vector.broadcast %cst_36 : f32 to vector<128x128xf32>
    %49 = arith.divf %48, %47 : vector<128x128xf32>
    %c0_37 = arith.constant 0 : index
    %c0_38 = arith.constant 0 : index
    %50 = vector.load %arg5[%c0_37, %c0_38] : memref<128x128xf32, #tpu.memory_space<vmem>>, vector<128x128xf32>
    tpu.vector_store %arg5[%c0_37, %c0_38], %49 {strides = array<i32>} : memref<128x128xf32, #tpu.memory_space<vmem>>, vector<128x128xf32>,
    return
  }
  func.func @transform_0(%arg0: i32) -> (i32, i32) {
    %c0_i32 = arith.constant 0 : i32
    %c0_i32_0 = arith.constant 0 : i32
    return %arg0, %c0_i32 : i32, i32
  }
  func.func @transform_1(%arg0: i32) -> (i32, i32) {
    %c0_i32 = arith.constant 0 : i32
    %c0_i32_0 = arith.constant 0 : i32
    %c0_i32_1 = arith.constant 0 : i32
    return %c0_i32, %c0_i32_0 : i32, i32
  }
  func.func @transform_2(%arg0: i32) -> (i32, i32, i32) {
    %c0_i32 = arith.constant 0 : i32
    %c0_i32_0 = arith.constant 0 : i32
    %c0_i32_1 = arith.constant 0 : i32
    %c0_i32_2 = arith.constant 0 : i32
    return %c0_i32, %c0_i32_0, %c0_i32_1 : i32, i32, i32
  }
  func.func @transform_3(%arg0: i32) -> (i32, i32, i32) {
    %c0_i32 = arith.constant 0 : i32
    %c0_i32_0 = arith.constant 0 : i32
    %c0_i32_1 = arith.constant 0 : i32
    %c0_i32_2 = arith.constant 0 : i32
    return %c0_i32, %c0_i32_0, %c0_i32_1 : i32, i32, i32
  }
  func.func @transform_4(%arg0: i32) -> (i32, i32) {
    %c0_i32 = arith.constant 0 : i32
    %c0_i32_0 = arith.constant 0 : i32
    return %arg0, %c0_i32 : i32, i32
  }
}

</mosaic_0001>

<bundles_post_ra>
// kernel: autoencoder_forward.1
= control target key start
LH: loop header
LB: loop body
LE: loop exit
PB: predicated region body
PF: predicated region fallthrough
CT: control target
= control target key end

     0   :  { %9 = vsyncpa [#allocation3], 0  ;;  %s2088_s15 = smov 0   ;;  %s2248_s0 = inlined_call_operand.vmem [shape: f32[256,20], index: 0, kind: input, shape index: {}]   ;;  %s2249_s1 = inlined_call_operand.vmem [shape: f32[20,128], index: 1, kind: input, shape index: {}]   ;;  %s2250_s2 = inlined_call_operand.hbm [shape: f32[4,128,128], index: 2, kind: input, shape index: {}]   ;;  %s2251_s3 = inlined_call_operand.vmem [shape: f32[5,1,128], index: 3, kind: input, shape index: {}]   ;;  %s2252_s4 = inlined_call_operand.vmem [shape: f32[256,128], index: 4, kind: output, shape index: {}]  }
   0x1 LB: > { %s1363_s16 = sadd.s32 4294967295, %s2058_s15   ;;  %p1365_p0 = scmp.ge.s32.totalorder %s2058_s15, 1  ;;  %s2058_s15 = sphi %s2088_s15, %s15_s15  }
   0x2   : > { %p135_p1 = scmp.lt.s32.totalorder %s2058_s15, 3  ;;  %s2060_s17 = smov [#allocation2]  }
   0x3   : > { %s150_s18 = sshll.u32 %s2060_s17, 4  ;;  %p2102_p3 = scmp.eq.s32.totalorder %s1363_s16, 0  ;;  %s151_s18 = int_to_ptr.vmem [resolvable:$true] %s150_s18 }
   0x4   : > { %p2096_p2 = pnand %p1365_p0, %p135_p1  ;;  %s2020_s24 = scalar_lea.hbm %s2250_s2, 8192 }
   0x5   : > { %s2257_s20 = scalar_select %p2102_p3, 1, 0 }
   0x6   : > { %s2256_s19 = scalar_select %p2096_p2, 1, 0 }
   0x7   : > { %p1939_p4 = pneg %p2096_p2  ;;  %p2021_p6 = scmp.ne.s32.totalorder %s2250_s2, %s2020_s24 }
   0x8   : > { %p2027_p10 = scmp.lt.u32.totalorder %s2020_s24, %s2250_s2 }
   0x9   : > { %p2110_p5 = pnand %p2102_p3, %p1939_p4 }
   0xb   : > { %p2022_p7 = pneg %p2110_p5 }
   0xd   : > { %p2023_p8 = pnand %p2022_p7, %p2021_p6 }
   0xf   : > { %p2024_p9 = pneg %p2023_p8 }
  0x11   : > { %p2029_p11 = pnand %p2027_p10, %p2024_p9 }
  0x13   : > { %2032 = shalt.err (!%p2029_p11)
}
  0x14   : > { %s2033_s29 = scalar_lea.vmem %s151_s18, 8192  ;;  %p2041_p1 = scmp.lt.s32.totalorder %s151_s18, %s151_s18 }
  0x15   : > { %p2034_p12 = scmp.ne.s32.totalorder %s151_s18, %s2033_s29  ;;  %p2042_p4 = scmp.lt.s32.totalorder %s2033_s29, %s2033_s29 }
  0x17   : > { %p2036_p13 = pnand %p2034_p12, %p2022_p7  ;;  %p2043_p3 = por %p2042_p4, %p2041_p1 }
  0x19   : > { %p2037_p0 = pneg %p2036_p13 }
  0x1b   : > { %p2044_p2 = pnand %p2043_p3, %p2037_p0 }
  0x1d   : > { %2047 = shalt.err (!%p2044_p2)
}
  0x1e   : > { %s2061_s30 = smov 128   ;;  %s2062_s5 = smov 8  }
  0x1f   : > { %1942 = dma.hbm_to_vmem [thread:$0]  (!%p2110_p5), %s2250_s2, 8192, %s151_s18, [#allocation3], %s2061_s30, %s2061_s30, %s2062_s5  }
  0x20   : > { %p2259_p6 = scmp.ne.s32.totalorder %s2256_s19, 0 }
  0x21   : > { %p2260_p8 = scmp.ne.s32.totalorder (!%p2259_p6), %s2257_s20, 0 }
  0x22   : > { %178 = sbr.rel (%p2259_p6) target bundleno = 1197 (0x4ad), region = 36 }
  0x29   : > { %2053 = dma.done.wait (%p2260_p8), [#allocation3], 8192  }
  0x2a   : > { %2055 = vsyncadd (%p2260_p8), [#allocation3], 4294959104  ;;  %s1370_s8 = sshll.u32 %s1363_s16, 4  ;;  %vm242_vm0 = vcmask 162816   ;;  %v232_v0 = vld [vmem:[%s2249_s1] sm:$0xff]  ;;  %v233_v1 = vld [vmem:[%s2249_s1 + $0x8] sm:$0xff] }
  0x2b   : > { %p205_p2 = scmp.lt.s32.totalorder %s1370_s8, 31  ;;  %v1803_v2 = vpack.c.bf16 %v233_v1, %v232_v0  ;;  %v234_v4 = vld [vmem:[%s2249_s1 + $0x10] sm:$0xf]  ;;  %vm291_vm1 = vcmask 1043456   ;;  %v456_v6 = vld [vmem:[#allocation2] sm:$0xff]  ;;  %v457_v7 = vld [vmem:[#allocation2 + $0x8] sm:$0xff] }
  0x2c   : > { %v1807_v9 = vpack.c.bf16 %v457_v7, %v456_v6  ;;  %v458_v10 = vld [vmem:[#allocation2 + $0x10] sm:$0xff]  ;;  %v459_v11 = vld [vmem:[#allocation2 + $0x18] sm:$0xff]  ;;  %v460_v13 = vld [vmem:[#allocation2 + $0x20] sm:$0xff] }
  0x2d   : > { %s2262_s8 = smov (!%p205_p2, %s1370_s8), 31  ;;  %1804 = vmatprep.subr.bf16.mxu0 %v1803_v2  ;;  %v1811_v12 = vpack.c.bf16 %v459_v11, %v458_v10  ;;  %v461_v14 = vld [vmem:[#allocation2 + $0x28] sm:$0xff]  ;;  %v462_v18 = vld [vmem:[#allocation2 + $0x30] sm:$0xff]  ;;  %v463_v19 = vld [vmem:[#allocation2 + $0x38] sm:$0xff] }
  0x2e   : > { %s1371_s9 = sshll.u32 %s2262_s8, 3  ;;  %1806 = vmatpush3.bf16.msra.mxu0 %v1803_v2  ;;  %1808 = vmatprep.subr.bf16.mxu1 %v1807_v9  ;;  %v1815_v17 = vpack.c.bf16 %v461_v14, %v460_v13  ;;  %v1819_v22 = vpack.c.bf16 %v463_v19, %v462_v18  ;;  %v464_v23 = vld [vmem:[#allocation2 + $0x40] sm:$0xff]  ;;  %v465_v24 = vld [vmem:[#allocation2 + $0x48] sm:$0xff]  ;;  %v466_v28 = vld [vmem:[#allocation2 + $0x50] sm:$0xff] }
  0x2f   : > { %s2146_s12 = scalar_lea.vmem %s2248_s0, %s1371_s9  ;;  %1553 = vmatprep.subr.msk.mxu0 %vm291_vm1, %v234_v4  ;;  %1810 = vmatpush3.bf16.msra.mxu1 %v1807_v9  ;;  %v1823_v27 = vpack.c.bf16 %v465_v24, %v464_v23  ;;  %v467_v29 = vld [vmem:[#allocation2 + $0x58] sm:$0xff]  ;;  %v468_v33 = vld [vmem:[#allocation2 + $0x60] sm:$0xff]  ;;  %v469_v34 = vld [vmem:[#allocation2 + $0x68] sm:$0xff]  ;;  %s2225_s6 = scalar_lea.vmem %s2252_s4, %s1371_s9 }
  0x30   : > { %v216_v3 = vld [vmem:[%s2146_s12] sm:$0xff]  ;;  %v217_v5 = vld [vmem:[%s2146_s12 + $0x8] sm:$0xff]  ;;  %v218_v8 = vld [vmem:[%s2146_s12 + $0x10] sm:$0xff]  ;;  %1812 = vmatprep.subr.bf16.mxu1 %v1811_v12  ;;  %v1827_v32 = vpack.c.bf16 %v467_v29, %v466_v28  ;;  %v1831_v37 = vpack.c.bf16 %v469_v34, %v468_v33 }
  0x31   : > { %1555 = vmatprep.mubr.msk.f32.mxu0 %vm242_vm0, %v216_v3  ;;  %v219_v15 = vld [vmem:[%s2146_s12 + $0x18] sm:$0xff]  ;;  %v220_v16 = vld [vmem:[%s2146_s12 + $0x20] sm:$0xff]  ;;  %v221_v20 = vld [vmem:[%s2146_s12 + $0x28] sm:$0xff] }
  0x32   : > { %1554 = vmatpush3.msk.msra.mxu0 %vm291_vm1, %v234_v4  ;;  %v222_v21 = vld [vmem:[%s2146_s12 + $0x30] sm:$0xff]  ;;  %v223_v25 = vld [vmem:[%s2146_s12 + $0x38] sm:$0xff]  ;;  %v224_v26 = vld [vmem:[%s2146_s12 + $0x40] sm:$0xff] }
  0x33   : > { %1556 = vmatmul.mubr.msk.f32.vlgmr.msra.gmra.mrb[0].mxu0 %vm242_vm0, %v217_v5  ;;  %1814 = vmatpush3.bf16.msra.mxu1 %v1811_v12  ;;  %v225_v30 = vld [vmem:[%s2146_s12 + $0x48] sm:$0xff]  ;;  %v226_v31 = vld [vmem:[%s2146_s12 + $0x50] sm:$0xff]  ;;  %v227_v35 = vld [vmem:[%s2146_s12 + $0x58] sm:$0xff] }
  0x34   : > { %1558 = vmatprep.mubr.msk.f32.mxu0 %vm242_vm0, %v218_v8  ;;  %1816 = vmatprep.subr.bf16.mxu1 %v1815_v17  ;;  %v228_v36 = vld [vmem:[%s2146_s12 + $0x60] sm:$0xff]  ;;  %v229_v38 = vld [vmem:[%s2146_s12 + $0x68] sm:$0xff]  ;;  %v230_v39 = vld [vmem:[%s2146_s12 + $0x70] sm:$0xff] }
  0x35   : > { %v231_v40 = vld [vmem:[%s2146_s12 + $0x78] sm:$0xff]  ;;  %v470_v41 = vld [vmem:[#allocation2 + $0x70] sm:$0xff]  ;;  %v642_v44 = vld [vmem:[#allocation2 + $0x80] sm:$0xff] }
  0x36   : > { %v471_v42 = vld [vmem:[#allocation2 + $0x78] sm:$0xff]  ;;  %v643_v45 = vld [vmem:[#allocation2 + $0x88] sm:$0xff]  ;;  %v644_v46 = vld [vmem:[#allocation2 + $0x90] sm:$0xff] }
  0x37   : > { %1559 = vmatmul.mubr.msk.f32.gmra.mrb[2].mxu0 %vm242_vm0, %v219_v15  ;;  %1818 = vmatpush3.bf16.msra.mxu1 %v1815_v17  ;;  %v1835_v43 = vpack.c.bf16 %v471_v42, %v470_v41  ;;  %v1839_v47 = vpack.c.bf16 %v643_v45, %v642_v44  ;;  %v645_v48 = vld [vmem:[#allocation2 + $0x98] sm:$0xff]  ;;  %v646_v50 = vld [vmem:[#allocation2 + $0xa0] sm:$0xff]  ;;  %v647_v51 = vld [vmem:[#allocation2 + $0xa8] sm:$0xff] }
  0x38   : > { %1561 = vmatprep.mubr.msk.f32.mxu0 %vm242_vm0, %v220_v16  ;;  %1820 = vmatprep.subr.bf16.mxu1 %v1819_v22  ;;  %v1843_v49 = vpack.c.bf16 %v645_v48, %v644_v46  ;;  %v1847_v52 = vpack.c.bf16 %v647_v51, %v646_v50  ;;  %v648_v53 = vld [vmem:[#allocation2 + $0xb0] sm:$0xff]  ;;  %v649_v54 = vld [vmem:[#allocation2 + $0xb8] sm:$0xff]  ;;  %v650_v56 = vld [vmem:[#allocation2 + $0xc0] sm:$0xff] }
  0x39   : > { %1840 = vmatprep.subr.bf16.mxu0 %v1839_v47  ;;  %v1851_v55 = vpack.c.bf16 %v649_v54, %v648_v53  ;;  %v651_v57 = vld [vmem:[#allocation2 + $0xc8] sm:$0xff]  ;;  %v652_v59 = vld [vmem:[#allocation2 + $0xd0] sm:$0xff]  ;;  %v653_v60 = vld [vmem:[#allocation2 + $0xd8] sm:$0xff] }
  0x3a   : > { %1842 = vmatpush3.bf16.msra.mxu0 %v1839_v47  ;;  %v1855_v58 = vpack.c.bf16 %v651_v57, %v650_v56  ;;  %v1859_v61 = vpack.c.bf16 %v653_v60, %v652_v59  ;;  %v654_v62 = vld [vmem:[#allocation2 + $0xe0] sm:$0xff]  ;;  %v655_v63 = vld [vmem:[#allocation2 + $0xe8] sm:$0xff]  ;;  %v656_v50 = vld [vmem:[#allocation2 + $0xf0] sm:$0xff] }
  0x3b   : > { %1562 = vmatmul.mubr.msk.f32.gmra.mrb[4].mxu0 %vm242_vm0, %v221_v20  ;;  %1822 = vmatpush3.bf16.msra.mxu1 %v1819_v22  ;;  %v1863_v0 = vpack.c.bf16 %v655_v63, %v654_v62  ;;  %v1374_v1 = vld [vmem:[%s2251_s3] ss:$0 sm:$0xff]  ;;  %v657_v51 = vld [vmem:[#allocation2 + $0xf8] sm:$0xff]  ;;  %v829_v54 = vld [vmem:[#allocation2 + $0x108] sm:$0xff] }
  0x3c   : > { %1564 = vmatprep.mubr.msk.f32.mxu0 %vm242_vm0, %v222_v21  ;;  %1824 = vmatprep.subr.bf16.mxu1 %v1823_v27  ;;  %v828_v53 = vld [vmem:[#allocation2 + $0x100] sm:$0xff]  ;;  %v831_v57 = vld [vmem:[#allocation2 + $0x118] sm:$0xff]  ;;  %v833_v60 = vld [vmem:[#allocation2 + $0x128] sm:$0xff] }
  0x3d   : > { %1844 = vmatprep.subr.bf16.mxu0 %v1843_v49  ;;  %v1871_v56 = vpack.c.bf16 %v829_v54, %v828_v53  ;;  %v832_v59 = vld [vmem:[#allocation2 + $0x120] sm:$0xff]  ;;  %v834_v62 = vld [vmem:[#allocation2 + $0x130] sm:$0xff]  ;;  %v835_v63 = vld [vmem:[#allocation2 + $0x138] sm:$0xff] }
  0x3e   : > { %1846 = vmatpush3.bf16.msra.mxu0 %v1843_v49 }
  0x3f   : > { %1565 = vmatmul.mubr.msk.f32.gmra.mrb[6].mxu0 %vm242_vm0, %v223_v25  ;;  %1826 = vmatpush3.bf16.msra.mxu1 %v1823_v27 }
  0x40   : > { %1567 = vmatprep.mubr.msk.f32.mxu0 %vm242_vm0, %v224_v26  ;;  %1828 = vmatprep.subr.bf16.mxu1 %v1827_v32 }
  0x41   : > { %1848 = vmatprep.subr.bf16.mxu0 %v1847_v52 }
  0x42   : > { %1850 = vmatpush3.bf16.msra.mxu0 %v1847_v52  ;;  %v1867_v52 = vpack.c.bf16 %v657_v51, %v656_v50 }
  0x43   : > { %1568 = vmatmul.mubr.msk.f32.gmra.mrb[8].mxu0 %vm242_vm0, %v225_v30  ;;  %1830 = vmatpush3.bf16.msra.mxu1 %v1827_v32 }
  0x44   : > { %1570 = vmatprep.mubr.msk.f32.mxu0 %vm242_vm0, %v226_v31  ;;  %1832 = vmatprep.subr.bf16.mxu1 %v1831_v37 }
  0x45   : > { %1852 = vmatprep.subr.bf16.mxu0 %v1851_v55 }
  0x46   : > { %1854 = vmatpush3.bf16.msra.mxu0 %v1851_v55  ;;  %v830_v55 = vld [vmem:[#allocation2 + $0x110] sm:$0xff] }
  0x47   : > { %1571 = vmatmul.mubr.msk.f32.gmra.mrb[10].mxu0 %vm242_vm0, %v227_v35  ;;  %1834 = vmatpush3.bf16.msra.mxu1 %v1831_v37 }
  0x48   : > { %1573 = vmatprep.mubr.msk.f32.mxu0 %vm242_vm0, %v228_v36  ;;  %1836 = vmatprep.subr.bf16.mxu1 %v1835_v43 }
  0x49   : > { %1856 = vmatprep.subr.bf16.mxu0 %v1855_v58 }
  0x4a   : > { %1858 = vmatpush3.bf16.msra.mxu0 %v1855_v58  ;;  %v1875_v58 = vpack.c.bf16 %v831_v57, %v830_v55 }
  0x4b   : > { %1574 = vmatmul.mubr.msk.f32.gmra.mrb[12].mxu0 %vm242_vm0, %v229_v38  ;;  %1838 = vmatpush3.bf16.msra.mxu1 %v1835_v43 }
  0x4c   : > { %1576 = vmatprep.mubr.msk.f32.mxu0 %vm242_vm0, %v230_v39  ;;  %1860 = vmatprep.subr.bf16.mxu0 %v1859_v61 }
  0x4d   : > { %1872 = vmatprep.subr.bf16.mxu1 %v1871_v56 }
  0x4e   : > { %1862 = vmatpush3.bf16.msra.mxu0 %v1859_v61  ;;  %v1879_v61 = vpack.c.bf16 %v833_v60, %v832_v59  ;;  %v842_v59 = vld [vmem:[#allocation2 + $0x170] sm:$0xff]  ;;  %v843_v60 = vld [vmem:[#allocation2 + $0x178] sm:$0xff] }
  0x4f   : > { %1577 = vmatmul.mubr.msk.f32.gmra.mrb[14].mxu0 %vm242_vm0, %v231_v40  ;;  %1864 = vmatprep.subr.bf16.mxu0 %v1863_v0 }
  0x52   : > { %1866 = vmatpush3.bf16.msra.mxu0 %v1863_v0  ;;  %v1883_v0 = vpack.c.bf16 %v835_v63, %v834_v62  ;;  %v1014_v62 = vld [vmem:[#allocation2 + $0x180] sm:$0xff]  ;;  %v1015_v63 = vld [vmem:[#allocation2 + $0x188] sm:$0xff] }
  0x53   : > { %1868 = vmatprep.subr.bf16.mxu0 %v1867_v52 }
  0x56   : > { %1870 = vmatpush3.bf16.msra.mxu0 %v1867_v52 }
 0x106   : > { %v1557_v2 = vpop.f32.mrb[0].mxu0 }
 0x107   : > { %v367_v3 = vadd.f32 %v1557_v2, %v1374_v1  ;;  %v361_v4 = vpop.f32.mrb[1].mxu0  ;;  %v837_v2 = vld [vmem:[#allocation2 + $0x148] sm:$0xff] }
 0x108   : > { %v362_v5 = vadd.f32 %v1374_v1, %v361_v4  ;;  %v838_v4 = vld [vmem:[#allocation2 + $0x150] sm:$0xff] }
 0x109   : > { %v441_v8 = vmax.f32 %v367_v3, 0.0 }
 0x10a   : > { %v1560_v6 = vpop.f32.mrb[2].mxu0  ;;  %v440_v7 = vmax.f32 %v362_v5, 0.0  ;;  %v839_v5 = vld [vmem:[#allocation2 + $0x158] sm:$0xff] }
 0x10b   : > { %v377_v9 = vadd.f32 %v1560_v6, %v1374_v1  ;;  %v371_v10 = vpop.f32.mrb[3].mxu0  ;;  %v1891_v6 = vpack.c.bf16 %v839_v5, %v838_v4  ;;  %v1018_v4 = vld [vmem:[#allocation2 + $0x1a0] sm:$0xff]  ;;  %v1019_v5 = vld [vmem:[#allocation2 + $0x1a8] sm:$0xff] }
 0x10c   : > { %v372_v11 = vadd.f32 %v1374_v1, %v371_v10  ;;  %1611 = vmatprep.mubr.f32.mxu1 %v440_v7  ;;  %v840_v7 = vld [vmem:[#allocation2 + $0x160] sm:$0xff] }
 0x10d   : > { %1612 = vmatmul.mubr.f32.vlgmr.msra.gmra.mrb[0].mxu1 %v441_v8  ;;  %v443_v14 = vmax.f32 %v377_v9, 0.0  ;;  %v841_v8 = vld [vmem:[#allocation2 + $0x168] sm:$0xff]  ;;  %v1393_v10 = vld [vmem:[%s2251_s3 + $0x1] ss:$0 sm:$0xff] }
 0x10e   : > { %v442_v12 = vmax.f32 %v372_v11, 0.0  ;;  %v1563_v13 = vpop.f32.mrb[4].mxu0  ;;  %1874 = vmatpush3.bf16.msra.mxu1 %v1871_v56  ;;  %v1895_v9 = vpack.c.bf16 %v841_v8, %v840_v7  ;;  %v1020_v7 = vld [vmem:[#allocation2 + $0x1b0] sm:$0xff]  ;;  %v1021_v8 = vld [vmem:[#allocation2 + $0x1b8] sm:$0xff] }
 0x10f   : > { %v387_v15 = vadd.f32 %v1563_v13, %v1374_v1  ;;  %v381_v16 = vpop.f32.mrb[5].mxu0  ;;  %1876 = vmatprep.subr.bf16.mxu1 %v1875_v58 }
 0x110   : > { %v382_v17 = vadd.f32 %v1374_v1, %v381_v16  ;;  %1614 = vmatprep.mubr.f32.mxu1 %v442_v12 }
 0x111   : > { %1615 = vmatmul.mubr.f32.gmra.mrb[2].mxu1 %v443_v14  ;;  %v445_v20 = vmax.f32 %v387_v15, 0.0 }
 0x112   : > { %v444_v18 = vmax.f32 %v382_v17, 0.0  ;;  %v1566_v19 = vpop.f32.mrb[6].mxu0  ;;  %1878 = vmatpush3.bf16.msra.mxu1 %v1875_v58 }
 0x113   : > { %v397_v21 = vadd.f32 %v1566_v19, %v1374_v1  ;;  %v391_v22 = vpop.f32.mrb[7].mxu0  ;;  %1880 = vmatprep.subr.bf16.mxu1 %v1879_v61 }
 0x114   : > { %v392_v23 = vadd.f32 %v1374_v1, %v391_v22  ;;  %1617 = vmatprep.mubr.f32.mxu1 %v444_v18 }
 0x115   : > { %1618 = vmatmul.mubr.f32.gmra.mrb[4].mxu1 %v445_v20  ;;  %v447_v26 = vmax.f32 %v397_v21, 0.0 }
 0x116   : > { %v446_v24 = vmax.f32 %v392_v23, 0.0  ;;  %v1569_v25 = vpop.f32.mrb[8].mxu0  ;;  %1882 = vmatpush3.bf16.msra.mxu1 %v1879_v61  ;;  %v1899_v61 = vpack.c.bf16 %v843_v60, %v842_v59 }
 0x117   : > { %v407_v27 = vadd.f32 %v1569_v25, %v1374_v1  ;;  %v401_v28 = vpop.f32.mrb[9].mxu0  ;;  %1884 = vmatprep.subr.bf16.mxu1 %v1883_v0 }
 0x118   : > { %v402_v29 = vadd.f32 %v1374_v1, %v401_v28  ;;  %1620 = vmatprep.mubr.f32.mxu1 %v446_v24 }
 0x119   : > { %1621 = vmatmul.mubr.f32.gmra.mrb[6].mxu1 %v447_v26  ;;  %v449_v32 = vmax.f32 %v407_v27, 0.0 }
 0x11a   : > { %v448_v30 = vmax.f32 %v402_v29, 0.0  ;;  %v1572_v31 = vpop.f32.mrb[10].mxu0  ;;  %1886 = vmatpush3.bf16.msra.mxu1 %v1883_v0  ;;  %v1016_v0 = vld [vmem:[#allocation2 + $0x190] sm:$0xff] }
 0x11b   : > { %v417_v33 = vadd.f32 %v1572_v31, %v1374_v1  ;;  %v411_v34 = vpop.f32.mrb[11].mxu0 }
 0x11c   : > { %v412_v35 = vadd.f32 %v1374_v1, %v411_v34  ;;  %1623 = vmatprep.mubr.f32.mxu1 %v448_v30 }
 0x11d   : > { %1624 = vmatmul.mubr.f32.gmra.mrb[8].mxu1 %v449_v32  ;;  %v451_v38 = vmax.f32 %v417_v33, 0.0 }
 0x11e   : > { %v450_v36 = vmax.f32 %v412_v35, 0.0  ;;  %v1575_v37 = vpop.f32.mrb[12].mxu0 }
 0x11f   : > { %v427_v39 = vadd.f32 %v1575_v37, %v1374_v1  ;;  %v421_v40 = vpop.f32.mrb[13].mxu0 }
 0x120   : > { %v422_v41 = vadd.f32 %v1374_v1, %v421_v40  ;;  %1626 = vmatprep.mubr.f32.mxu1 %v450_v36 }
 0x121   : > { %1627 = vmatmul.mubr.f32.gmra.mrb[10].mxu1 %v451_v38  ;;  %v453_v44 = vmax.f32 %v427_v39, 0.0 }
 0x122   : > { %v452_v42 = vmax.f32 %v422_v41, 0.0  ;;  %v1578_v43 = vpop.f32.mrb[14].mxu0 }
 0x123   : > { %v437_v45 = vadd.f32 %v1578_v43, %v1374_v1  ;;  %v431_v46 = vpop.f32.mrb[15].mxu0 }
 0x124   : > { %v432_v47 = vadd.f32 %v1374_v1, %v431_v46  ;;  %1629 = vmatprep.mubr.f32.mxu1 %v452_v42  ;;  %v836_v1 = vld [vmem:[#allocation2 + $0x140] sm:$0xff] }
 0x125   : > { %1630 = vmatmul.mubr.f32.gmra.mrb[12].mxu1 %v453_v44  ;;  %v455_v49 = vmax.f32 %v437_v45, 0.0  ;;  %v1887_v3 = vpack.c.bf16 %v837_v2, %v836_v1  ;;  %v1903_v1 = vpack.c.bf16 %v1015_v63, %v1014_v62  ;;  %v1017_v2 = vld [vmem:[#allocation2 + $0x198] sm:$0xff] }
 0x126   : > { %v454_v48 = vmax.f32 %v432_v47, 0.0 }
 0x127   : > { %1888 = vmatprep.subr.bf16.mxu1 %v1887_v3  ;;  %1904 = vmatprep.subr.bf16.mxu0 %v1903_v1 }
 0x128   : > { %1632 = vmatprep.mubr.f32.mxu1 %v454_v48  ;;  %1890 = vmatpush3.bf16.msra.mxu1 %v1887_v3  ;;  %v1907_v3 = vpack.c.bf16 %v1017_v2, %v1016_v0 }
 0x129   : > { %1633 = vmatmul.mubr.f32.gmra.mrb[14].mxu1 %v455_v49  ;;  %1892 = vmatprep.subr.bf16.mxu1 %v1891_v6 }
 0x12c   : > { %1894 = vmatpush3.bf16.msra.mxu1 %v1891_v6  ;;  %v1911_v6 = vpack.c.bf16 %v1019_v5, %v1018_v4  ;;  %v1028_v4 = vld [vmem:[#allocation2 + $0x1f0] sm:$0xff]  ;;  %v1029_v5 = vld [vmem:[#allocation2 + $0x1f8] sm:$0xff] }
 0x12d   : > { %1896 = vmatprep.subr.bf16.mxu1 %v1895_v9 }
 0x130   : > { %1898 = vmatpush3.bf16.msra.mxu1 %v1895_v9  ;;  %v1915_v9 = vpack.c.bf16 %v1021_v8, %v1020_v7  ;;  %v1397_v7 = vld [vmem:[%s2251_s3 + $0x3] ss:$0 sm:$0xff] }
 0x131   : > { %1900 = vmatprep.subr.bf16.mxu1 %v1899_v61 }
 0x134   : > { %1902 = vmatpush3.bf16.msra.mxu1 %v1899_v61 }
 0x1e0   : > { %v1613_v11 = vpop.f32.mrb[0].mxu1 }
 0x1e1   : > { %v552_v12 = vadd.f32 %v1613_v11, %v1393_v10  ;;  %v546_v13 = vpop.f32.mrb[1].mxu1  ;;  %v1023_v11 = vld [vmem:[#allocation2 + $0x1c8] sm:$0xff] }
 0x1e2   : > { %v547_v14 = vadd.f32 %v1393_v10, %v546_v13  ;;  %v1024_v13 = vld [vmem:[#allocation2 + $0x1d0] sm:$0xff] }
 0x1e3   : > { %v626_v17 = vmax.f32 %v552_v12, 0.0 }
 0x1e4   : > { %v625_v15 = vmax.f32 %v547_v14, 0.0  ;;  %v1616_v16 = vpop.f32.mrb[2].mxu1  ;;  %v1025_v14 = vld [vmem:[#allocation2 + $0x1d8] sm:$0xff] }
 0x1e5   : > { %v562_v18 = vadd.f32 %v1616_v16, %v1393_v10  ;;  %v556_v19 = vpop.f32.mrb[3].mxu1  ;;  %v1026_v16 = vld [vmem:[#allocation2 + $0x1e0] sm:$0xff] }
 0x1e6   : > { %v557_v20 = vadd.f32 %v1393_v10, %v556_v19  ;;  %1667 = vmatprep.mubr.f32.mxu0 %v625_v15  ;;  %v1923_v15 = vpack.c.bf16 %v1025_v14, %v1024_v13  ;;  %v1395_v19 = vld [vmem:[%s2251_s3 + $0x2] ss:$0 sm:$0xff] }
 0x1e7   : > { %1668 = vmatmul.mubr.f32.vlgmr.msra.gmra.mrb[16].mxu0 %v626_v17  ;;  %v628_v23 = vmax.f32 %v562_v18, 0.0  ;;  %v1027_v17 = vld [vmem:[#allocation2 + $0x1e8] sm:$0xff] }
 0x1e8   : > { %v627_v21 = vmax.f32 %v557_v20, 0.0  ;;  %v1619_v22 = vpop.f32.mrb[4].mxu1  ;;  %1906 = vmatpush3.bf16.msra.mxu0 %v1903_v1  ;;  %v1927_v18 = vpack.c.bf16 %v1027_v17, %v1026_v16 }
 0x1e9   : > { %v572_v24 = vadd.f32 %v1619_v22, %v1393_v10  ;;  %v566_v25 = vpop.f32.mrb[5].mxu1  ;;  %1908 = vmatprep.subr.bf16.mxu0 %v1907_v3 }
 0x1ea   : > { %v567_v26 = vadd.f32 %v1393_v10, %v566_v25  ;;  %1670 = vmatprep.mubr.f32.mxu0 %v627_v21 }
 0x1eb   : > { %1671 = vmatmul.mubr.f32.gmra.mrb[18].mxu0 %v628_v23  ;;  %v630_v29 = vmax.f32 %v572_v24, 0.0 }
 0x1ec   : > { %v629_v27 = vmax.f32 %v567_v26, 0.0  ;;  %v1622_v28 = vpop.f32.mrb[6].mxu1  ;;  %1910 = vmatpush3.bf16.msra.mxu0 %v1907_v3 }
 0x1ed   : > { %v582_v30 = vadd.f32 %v1622_v28, %v1393_v10  ;;  %v576_v31 = vpop.f32.mrb[7].mxu1  ;;  %1912 = vmatprep.subr.bf16.mxu0 %v1911_v6 }
 0x1ee   : > { %v577_v32 = vadd.f32 %v1393_v10, %v576_v31  ;;  %1673 = vmatprep.mubr.f32.mxu0 %v629_v27 }
 0x1ef   : > { %1674 = vmatmul.mubr.f32.gmra.mrb[20].mxu0 %v630_v29  ;;  %v632_v35 = vmax.f32 %v582_v30, 0.0 }
 0x1f0   : > { %v631_v33 = vmax.f32 %v577_v32, 0.0  ;;  %v1625_v34 = vpop.f32.mrb[8].mxu1  ;;  %1914 = vmatpush3.bf16.msra.mxu0 %v1911_v6  ;;  %v1931_v6 = vpack.c.bf16 %v1029_v5, %v1028_v4 }
 0x1f1   : > { %v592_v36 = vadd.f32 %v1625_v34, %v1393_v10  ;;  %v586_v37 = vpop.f32.mrb[9].mxu1  ;;  %1916 = vmatprep.subr.bf16.mxu0 %v1915_v9 }
 0x1f2   : > { %v587_v38 = vadd.f32 %v1393_v10, %v586_v37  ;;  %1676 = vmatprep.mubr.f32.mxu0 %v631_v33 }
 0x1f3   : > { %1677 = vmatmul.mubr.f32.gmra.mrb[22].mxu0 %v632_v35  ;;  %v634_v41 = vmax.f32 %v592_v36, 0.0 }
 0x1f4   : > { %v633_v39 = vmax.f32 %v587_v38, 0.0  ;;  %v1628_v40 = vpop.f32.mrb[10].mxu1  ;;  %1918 = vmatpush3.bf16.msra.mxu0 %v1915_v9 }
 0x1f5   : > { %v602_v42 = vadd.f32 %v1628_v40, %v1393_v10  ;;  %v596_v43 = vpop.f32.mrb[11].mxu1 }
 0x1f6   : > { %v597_v44 = vadd.f32 %v1393_v10, %v596_v43  ;;  %1679 = vmatprep.mubr.f32.mxu0 %v633_v39 }
 0x1f7   : > { %1680 = vmatmul.mubr.f32.gmra.mrb[24].mxu0 %v634_v41  ;;  %v636_v47 = vmax.f32 %v602_v42, 0.0 }
 0x1f8   : > { %v635_v45 = vmax.f32 %v597_v44, 0.0  ;;  %v1631_v46 = vpop.f32.mrb[12].mxu1 }
 0x1f9   : > { %v612_v48 = vadd.f32 %v1631_v46, %v1393_v10  ;;  %v606_v49 = vpop.f32.mrb[13].mxu1 }
 0x1fa   : > { %v607_v50 = vadd.f32 %v1393_v10, %v606_v49  ;;  %1682 = vmatprep.mubr.f32.mxu0 %v635_v45 }
 0x1fb   : > { %1683 = vmatmul.mubr.f32.gmra.mrb[26].mxu0 %v636_v47  ;;  %v638_v53 = vmax.f32 %v612_v48, 0.0 }
 0x1fc   : > { %v637_v51 = vmax.f32 %v607_v50, 0.0  ;;  %v1634_v52 = vpop.f32.mrb[14].mxu1 }
 0x1fd   : > { %v622_v54 = vadd.f32 %v1634_v52, %v1393_v10  ;;  %v616_v55 = vpop.f32.mrb[15].mxu1 }
 0x1fe   : > { %v617_v56 = vadd.f32 %v1393_v10, %v616_v55  ;;  %1685 = vmatprep.mubr.f32.mxu0 %v637_v51  ;;  %v1022_v10 = vld [vmem:[#allocation2 + $0x1c0] sm:$0xff] }
 0x1ff   : > { %1686 = vmatmul.mubr.f32.gmra.mrb[28].mxu0 %v638_v53  ;;  %v640_v58 = vmax.f32 %v622_v54, 0.0  ;;  %v1919_v12 = vpack.c.bf16 %v1023_v11, %v1022_v10 }
 0x200   : > { %v639_v57 = vmax.f32 %v617_v56, 0.0 }
 0x201   : > { %1920 = vmatprep.subr.bf16.mxu0 %v1919_v12 }
 0x202   : > { %1688 = vmatprep.mubr.f32.mxu0 %v639_v57  ;;  %1922 = vmatpush3.bf16.msra.mxu0 %v1919_v12 }
 0x203   : > { %1689 = vmatmul.mubr.f32.gmra.mrb[30].mxu0 %v640_v58  ;;  %1924 = vmatprep.subr.bf16.mxu0 %v1923_v15 }
 0x206   : > { %1926 = vmatpush3.bf16.msra.mxu0 %v1923_v15 }
 0x207   : > { %1928 = vmatprep.subr.bf16.mxu0 %v1927_v18 }
 0x20a   : > { %1930 = vmatpush3.bf16.msra.mxu0 %v1927_v18 }
 0x20b   : > { %1932 = vmatprep.subr.bf16.mxu0 %v1931_v6 }
 0x20e   : > { %1934 = vmatpush3.bf16.msra.mxu0 %v1931_v6 }
 0x2ba   : > { %v1669_v20 = vpop.f32.mrb[16].mxu0 }
 0x2bb   : > { %v738_v21 = vadd.f32 %v1669_v20, %v1395_v19  ;;  %v732_v22 = vpop.f32.mrb[17].mxu0 }
 0x2bc   : > { %v733_v23 = vadd.f32 %v1395_v19, %v732_v22 }
 0x2bd   : > { %v812_v26 = vmax.f32 %v738_v21, 0.0 }
 0x2be   : > { %v811_v24 = vmax.f32 %v733_v23, 0.0  ;;  %v1672_v25 = vpop.f32.mrb[18].mxu0 }
 0x2bf   : > { %v748_v27 = vadd.f32 %v1672_v25, %v1395_v19  ;;  %v742_v28 = vpop.f32.mrb[19].mxu0 }
 0x2c0   : > { %v743_v29 = vadd.f32 %v1395_v19, %v742_v28  ;;  %1723 = vmatprep.mubr.f32.mxu1 %v811_v24 }
 0x2c1   : > { %1724 = vmatmul.mubr.f32.vlgmr.msra.gmra.mrb[16].mxu1 %v812_v26  ;;  %v814_v32 = vmax.f32 %v748_v27, 0.0 }
 0x2c2   : > { %v813_v30 = vmax.f32 %v743_v29, 0.0  ;;  %v1675_v31 = vpop.f32.mrb[20].mxu0 }
 0x2c3   : > { %v758_v33 = vadd.f32 %v1675_v31, %v1395_v19  ;;  %v752_v34 = vpop.f32.mrb[21].mxu0 }
 0x2c4   : > { %v753_v35 = vadd.f32 %v1395_v19, %v752_v34  ;;  %1726 = vmatprep.mubr.f32.mxu1 %v813_v30 }
 0x2c5   : > { %1727 = vmatmul.mubr.f32.gmra.mrb[18].mxu1 %v814_v32  ;;  %v816_v38 = vmax.f32 %v758_v33, 0.0 }
 0x2c6   : > { %v815_v36 = vmax.f32 %v753_v35, 0.0  ;;  %v1678_v37 = vpop.f32.mrb[22].mxu0 }
 0x2c7   : > { %v768_v39 = vadd.f32 %v1678_v37, %v1395_v19  ;;  %v762_v40 = vpop.f32.mrb[23].mxu0 }
 0x2c8   : > { %v763_v41 = vadd.f32 %v1395_v19, %v762_v40  ;;  %1729 = vmatprep.mubr.f32.mxu1 %v815_v36 }
 0x2c9   : > { %1730 = vmatmul.mubr.f32.gmra.mrb[20].mxu1 %v816_v38  ;;  %v818_v44 = vmax.f32 %v768_v39, 0.0 }
 0x2ca   : > { %v817_v42 = vmax.f32 %v763_v41, 0.0  ;;  %v1681_v43 = vpop.f32.mrb[24].mxu0 }
 0x2cb   : > { %v778_v45 = vadd.f32 %v1681_v43, %v1395_v19  ;;  %v772_v46 = vpop.f32.mrb[25].mxu0 }
 0x2cc   : > { %v773_v47 = vadd.f32 %v1395_v19, %v772_v46  ;;  %1732 = vmatprep.mubr.f32.mxu1 %v817_v42 }
 0x2cd   : > { %1733 = vmatmul.mubr.f32.gmra.mrb[22].mxu1 %v818_v44  ;;  %v820_v50 = vmax.f32 %v778_v45, 0.0 }
 0x2ce   : > { %v819_v48 = vmax.f32 %v773_v47, 0.0  ;;  %v1684_v49 = vpop.f32.mrb[26].mxu0 }
 0x2cf   : > { %v788_v51 = vadd.f32 %v1684_v49, %v1395_v19  ;;  %v782_v52 = vpop.f32.mrb[27].mxu0 }
 0x2d0   : > { %v783_v53 = vadd.f32 %v1395_v19, %v782_v52  ;;  %1735 = vmatprep.mubr.f32.mxu1 %v819_v48 }
 0x2d1   : > { %1736 = vmatmul.mubr.f32.gmra.mrb[24].mxu1 %v820_v50  ;;  %v822_v56 = vmax.f32 %v788_v51, 0.0 }
 0x2d2   : > { %v821_v54 = vmax.f32 %v783_v53, 0.0  ;;  %v1687_v55 = vpop.f32.mrb[28].mxu0 }
 0x2d3   : > { %v798_v57 = vadd.f32 %v1687_v55, %v1395_v19  ;;  %v792_v58 = vpop.f32.mrb[29].mxu0 }
 0x2d4   : > { %v793_v59 = vadd.f32 %v1395_v19, %v792_v58  ;;  %1738 = vmatprep.mubr.f32.mxu1 %v821_v54 }
 0x2d5   : > { %1739 = vmatmul.mubr.f32.gmra.mrb[26].mxu1 %v822_v56  ;;  %v824_v62 = vmax.f32 %v798_v57, 0.0  ;;  %v2204_v56 = vld [vmem:[%s2251_s3 + $0x4] ss:$0 sm:$0xff] }
 0x2d6   : > { %v823_v60 = vmax.f32 %v793_v59, 0.0  ;;  %v1690_v61 = vpop.f32.mrb[30].mxu0 }
 0x2d7   : > { %v808_v63 = vadd.f32 %v1690_v61, %v1395_v19  ;;  %v802_v0 = vpop.f32.mrb[31].mxu0 }
 0x2d8   : > { %v803_v1 = vadd.f32 %v1395_v19, %v802_v0  ;;  %1741 = vmatprep.mubr.f32.mxu1 %v823_v60 }
 0x2d9   : > { %1742 = vmatmul.mubr.f32.gmra.mrb[28].mxu1 %v824_v62  ;;  %v826_v3 = vmax.f32 %v808_v63, 0.0 }
 0x2da   : > { %v825_v2 = vmax.f32 %v803_v1, 0.0 }
 0x2dc   : > { %1744 = vmatprep.mubr.f32.mxu1 %v825_v2 }
 0x2dd   : > { %1745 = vmatmul.mubr.f32.gmra.mrb[30].mxu1 %v826_v3 }
 0x394   : > { %v1725_v8 = vpop.f32.mrb[16].mxu1 }
 0x395   : > { %v924_v9 = vadd.f32 %v1725_v8, %v1397_v7  ;;  %v918_v10 = vpop.f32.mrb[17].mxu1 }
 0x396   : > { %v919_v11 = vadd.f32 %v1397_v7, %v918_v10 }
 0x397   : > { %v998_v14 = vmax.f32 %v924_v9, 0.0 }
 0x398   : > { %v997_v12 = vmax.f32 %v919_v11, 0.0  ;;  %v1728_v13 = vpop.f32.mrb[18].mxu1 }
 0x399   : > { %v934_v15 = vadd.f32 %v1728_v13, %v1397_v7  ;;  %v928_v16 = vpop.f32.mrb[19].mxu1 }
 0x39a   : > { %v929_v17 = vadd.f32 %v1397_v7, %v928_v16  ;;  %1779 = vmatprep.mubr.f32.mxu0 %v997_v12 }
 0x39b   : > { %1780 = vmatmul.mubr.f32.vlgmr.msra.gmra.mrb[32].mxu0 %v998_v14  ;;  %v1000_v20 = vmax.f32 %v934_v15, 0.0 }
 0x39c   : > { %v999_v18 = vmax.f32 %v929_v17, 0.0  ;;  %v1731_v19 = vpop.f32.mrb[20].mxu1 }
 0x39d   : > { %v944_v21 = vadd.f32 %v1731_v19, %v1397_v7  ;;  %v938_v22 = vpop.f32.mrb[21].mxu1 }
 0x39e   : > { %v939_v23 = vadd.f32 %v1397_v7, %v938_v22  ;;  %1782 = vmatprep.mubr.f32.mxu0 %v999_v18 }
 0x39f   : > { %1783 = vmatmul.mubr.f32.gmra.mrb[34].mxu0 %v1000_v20  ;;  %v1002_v26 = vmax.f32 %v944_v21, 0.0 }
 0x3a0   : > { %v1001_v24 = vmax.f32 %v939_v23, 0.0  ;;  %v1734_v25 = vpop.f32.mrb[22].mxu1 }
 0x3a1   : > { %v954_v27 = vadd.f32 %v1734_v25, %v1397_v7  ;;  %v948_v28 = vpop.f32.mrb[23].mxu1 }
 0x3a2   : > { %v949_v29 = vadd.f32 %v1397_v7, %v948_v28  ;;  %1785 = vmatprep.mubr.f32.mxu0 %v1001_v24 }
 0x3a3   : > { %1786 = vmatmul.mubr.f32.gmra.mrb[36].mxu0 %v1002_v26  ;;  %v1004_v32 = vmax.f32 %v954_v27, 0.0 }
 0x3a4   : > { %v1003_v30 = vmax.f32 %v949_v29, 0.0  ;;  %v1737_v31 = vpop.f32.mrb[24].mxu1 }
 0x3a5   : > { %v964_v33 = vadd.f32 %v1737_v31, %v1397_v7  ;;  %v958_v34 = vpop.f32.mrb[25].mxu1 }
 0x3a6   : > { %v959_v35 = vadd.f32 %v1397_v7, %v958_v34  ;;  %1788 = vmatprep.mubr.f32.mxu0 %v1003_v30 }
 0x3a7   : > { %1789 = vmatmul.mubr.f32.gmra.mrb[38].mxu0 %v1004_v32  ;;  %v1006_v38 = vmax.f32 %v964_v33, 0.0 }
 0x3a8   : > { %v1005_v36 = vmax.f32 %v959_v35, 0.0  ;;  %v1740_v37 = vpop.f32.mrb[26].mxu1 }
 0x3a9   : > { %v974_v39 = vadd.f32 %v1740_v37, %v1397_v7  ;;  %v968_v40 = vpop.f32.mrb[27].mxu1 }
 0x3aa   : > { %v969_v41 = vadd.f32 %v1397_v7, %v968_v40  ;;  %1791 = vmatprep.mubr.f32.mxu0 %v1005_v36 }
 0x3ab   : > { %1792 = vmatmul.mubr.f32.gmra.mrb[40].mxu0 %v1006_v38  ;;  %v1008_v44 = vmax.f32 %v974_v39, 0.0 }
 0x3ac   : > { %v1007_v42 = vmax.f32 %v969_v41, 0.0  ;;  %v1743_v43 = vpop.f32.mrb[28].mxu1 }
 0x3ad   : > { %v984_v45 = vadd.f32 %v1743_v43, %v1397_v7  ;;  %v978_v46 = vpop.f32.mrb[29].mxu1 }
 0x3ae   : > { %v979_v47 = vadd.f32 %v1397_v7, %v978_v46  ;;  %1794 = vmatprep.mubr.f32.mxu0 %v1007_v42 }
 0x3af   : > { %1795 = vmatmul.mubr.f32.gmra.mrb[42].mxu0 %v1008_v44  ;;  %v1010_v50 = vmax.f32 %v984_v45, 0.0 }
 0x3b0   : > { %v1009_v48 = vmax.f32 %v979_v47, 0.0  ;;  %v1746_v49 = vpop.f32.mrb[30].mxu1 }
 0x3b1   : > { %v994_v51 = vadd.f32 %v1746_v49, %v1397_v7  ;;  %v988_v52 = vpop.f32.mrb[31].mxu1 }
 0x3b2   : > { %v989_v53 = vadd.f32 %v1397_v7, %v988_v52  ;;  %1797 = vmatprep.mubr.f32.mxu0 %v1009_v48 }
 0x3b3   : > { %1798 = vmatmul.mubr.f32.gmra.mrb[44].mxu0 %v1010_v50  ;;  %v1012_v55 = vmax.f32 %v994_v51, 0.0 }
 0x3b4   : > { %v1011_v54 = vmax.f32 %v989_v53, 0.0 }
 0x3b6   : > { %1800 = vmatprep.mubr.f32.mxu0 %v1011_v54 }
 0x3b7   : > { %1801 = vmatmul.mubr.f32.gmra.mrb[46].mxu0 %v1012_v55 }
 0x46e   : > { %v1781_v57 = vpop.f32.mrb[32].mxu0 }
 0x46f   : > { %v1110_v58 = vadd.f32 %v1781_v57, %v2204_v56  ;;  %v1104_v59 = vpop.f32.mrb[33].mxu0 }
 0x470   : > { %v1105_v60 = vadd.f32 %v2204_v56, %v1104_v59 }
 0x471   : > { %v1184_v61 = vsub.f32 0.0, %v1110_v58 }
 0x472   : > { %v1183_v62 = vsub.f32 0.0, %v1105_v60  ;;  %v1784_v63 = vpop.f32.mrb[34].mxu0 }
 0x473   : > { %v1201_v0 = vmul.f32 1.442695, %v1184_v61  ;;  %v1120_v1 = vadd.f32 %v1784_v63, %v2204_v56  ;;  %v1114_v2 = vpop.f32.mrb[35].mxu0 }
 0x474   : > { %v1199_v3 = vmul.f32 1.442695, %v1183_v62  ;;  %v1115_v4 = vadd.f32 %v2204_v56, %v1114_v2 }
 0x475   : > { %1956 = vpow2.f32 %v1201_v0  ;;  %v1186_v5 = vsub.f32 0.0, %v1120_v1 }
 0x476   : > { %1958 = vpow2.f32 %v1199_v3  ;;  %v1185_v6 = vsub.f32 0.0, %v1115_v4  ;;  %v1787_v7 = vpop.f32.mrb[36].mxu0 }
 0x477   : > { %v1205_v8 = vmul.f32 1.442695, %v1186_v5  ;;  %v1130_v9 = vadd.f32 %v1787_v7, %v2204_v56  ;;  %v1124_v10 = vpop.f32.mrb[37].mxu0 }
 0x478   : > { %v1203_v11 = vmul.f32 1.442695, %v1185_v6  ;;  %v1125_v12 = vadd.f32 %v2204_v56, %v1124_v10 }
 0x479   : > { %1960 = vpow2.f32 %v1205_v8  ;;  %v1188_v13 = vsub.f32 0.0, %v1130_v9 }
 0x47a   : > { %1962 = vpow2.f32 %v1203_v11  ;;  %v1187_v14 = vsub.f32 0.0, %v1125_v12  ;;  %v1790_v15 = vpop.f32.mrb[38].mxu0 }
 0x47b   : > { %v1209_v16 = vmul.f32 1.442695, %v1188_v13  ;;  %v1140_v17 = vadd.f32 %v1790_v15, %v2204_v56  ;;  %v1134_v18 = vpop.f32.mrb[39].mxu0 }
 0x47c   : > { %v1207_v19 = vmul.f32 1.442695, %v1187_v14  ;;  %v1135_v20 = vadd.f32 %v2204_v56, %v1134_v18 }
 0x47d   : > { %1964 = vpow2.f32 %v1209_v16  ;;  %v1190_v21 = vsub.f32 0.0, %v1140_v17 }
 0x47e   : > { %1966 = vpow2.f32 %v1207_v19  ;;  %v1189_v22 = vsub.f32 0.0, %v1135_v20  ;;  %v1793_v23 = vpop.f32.mrb[40].mxu0 }
 0x47f   : > { %v1957_v24 = vpop.eup %1956  ;;  %v1213_v25 = vmul.f32 1.442695, %v1190_v21  ;;  %v1150_v26 = vadd.f32 %v1793_v23, %v2204_v56  ;;  %v1144_v27 = vpop.f32.mrb[41].mxu0 }
 0x480   : > { %v1959_v28 = vpop.eup %1958  ;;  %v1232_v29 = vadd.f32 1.0, %v1957_v24  ;;  %v1211_v30 = vmul.f32 1.442695, %v1189_v22  ;;  %v1145_v31 = vadd.f32 %v2204_v56, %v1144_v27 }
 0x481   : > { %v1231_v32 = vadd.f32 1.0, %v1959_v28  ;;  %1968 = vpow2.f32 %v1213_v25  ;;  %v1192_v33 = vsub.f32 0.0, %v1150_v26 }
 0x482   : > { %1970 = vrcp.f32 %v1232_v29  ;;  %v1191_v34 = vsub.f32 0.0, %v1145_v31  ;;  %v1796_v35 = vpop.f32.mrb[42].mxu0 }
 0x483   : > { %v1961_v36 = vpop.eup %1960  ;;  %1972 = vrcp.f32 %v1231_v32  ;;  %v1217_v37 = vmul.f32 1.442695, %v1192_v33  ;;  %v1160_v38 = vadd.f32 %v1796_v35, %v2204_v56  ;;  %v1154_v39 = vpop.f32.mrb[43].mxu0 }
 0x484   : > { %v1963_v40 = vpop.eup %1962  ;;  %v1234_v41 = vadd.f32 1.0, %v1961_v36  ;;  %1974 = vpow2.f32 %v1211_v30  ;;  %v1215_v42 = vmul.f32 1.442695, %v1191_v34  ;;  %v1155_v43 = vadd.f32 %v2204_v56, %v1154_v39 }
 0x485   : > { %v1233_v44 = vadd.f32 1.0, %v1963_v40  ;;  %1976 = vpow2.f32 %v1217_v37  ;;  %v1194_v45 = vsub.f32 0.0, %v1160_v38 }
 0x486   : > { %1978 = vrcp.f32 %v1234_v41  ;;  %v1193_v46 = vsub.f32 0.0, %v1155_v43  ;;  %v1799_v47 = vpop.f32.mrb[44].mxu0 }
 0x487   : > { %v1965_v48 = vpop.eup %1964  ;;  %1980 = vrcp.f32 %v1233_v44  ;;  %v1221_v49 = vmul.f32 1.442695, %v1194_v45  ;;  %v1170_v50 = vadd.f32 %v1799_v47, %v2204_v56  ;;  %v1164_v51 = vpop.f32.mrb[45].mxu0 }
 0x488   : > { %v1967_v52 = vpop.eup %1966  ;;  %v1236_v53 = vadd.f32 1.0, %v1965_v48  ;;  %1982 = vpow2.f32 %v1215_v42  ;;  %v1219_v54 = vmul.f32 1.442695, %v1193_v46  ;;  %v1165_v55 = vadd.f32 %v2204_v56, %v1164_v51 }
 0x489   : > { %v1235_v57 = vadd.f32 1.0, %v1967_v52  ;;  %1984 = vpow2.f32 %v1221_v49  ;;  %v1196_v58 = vsub.f32 0.0, %v1170_v50 }
 0x48a   : > { %1986 = vrcp.f32 %v1236_v53  ;;  %v1195_v59 = vsub.f32 0.0, %v1165_v55  ;;  %v1802_v60 = vpop.f32.mrb[46].mxu0 }
 0x48b   : > { %v1969_v61 = vpop.eup %1968  ;;  %1988 = vrcp.f32 %v1235_v57  ;;  %v1225_v62 = vmul.f32 1.442695, %v1196_v58  ;;  %v1180_v63 = vadd.f32 %v1802_v60, %v2204_v56  ;;  %v1174_v0 = vpop.f32.mrb[47].mxu0 }
 0x48c   : > { %v1971_v1 = vpop.eup %1970  ;;  %v1238_v2 = vadd.f32 1.0, %v1969_v61  ;;  %1990 = vpow2.f32 %v1219_v54  ;;  %v1223_v3 = vmul.f32 1.442695, %v1195_v59  ;;  %v1175_v4 = vadd.f32 %v2204_v56, %v1174_v0 }
 0x48d   : > { %v1973_v5 = vpop.eup %1972  ;;  %1280 = vst [vmem:[%s2225_s6 + $0x8] sm:$0xff] %v1971_v1  ;;  %1992 = vpow2.f32 %v1225_v62  ;;  %v1198_v6 = vsub.f32 0.0, %v1180_v63 }
 0x48e   : > { %v1975_v7 = vpop.eup %1974  ;;  %1279 = vst [vmem:[%s2225_s6] sm:$0xff] %v1973_v5  ;;  %1994 = vrcp.f32 %v1238_v2  ;;  %v1197_v8 = vsub.f32 0.0, %v1175_v4 }
 0x48f   : > { %v1977_v9 = vpop.eup %1976  ;;  %v1237_v10 = vadd.f32 1.0, %v1975_v7  ;;  %1996 = vpow2.f32 %v1223_v3  ;;  %v1229_v11 = vmul.f32 1.442695, %v1198_v6 }
 0x490   : > { %v1979_v12 = vpop.eup %1978  ;;  %v1240_v13 = vadd.f32 1.0, %v1977_v9  ;;  %v1227_v14 = vmul.f32 1.442695, %v1197_v8 }
 0x491   : > { %v1981_v15 = vpop.eup %1980  ;;  %1282 = vst [vmem:[%s2225_s6 + $0x18] sm:$0xff] %v1979_v12  ;;  %1998 = vrcp.f32 %v1237_v10 }
 0x492   : > { %v1983_v56 = vpop.eup %1982  ;;  %1281 = vst [vmem:[%s2225_s6 + $0x10] sm:$0xff] %v1981_v15  ;;  %2000 = vrcp.f32 %v1240_v13 }
 0x493   : > { %v1985_v16 = vpop.eup %1984  ;;  %v1239_v17 = vadd.f32 1.0, %v1983_v56  ;;  %2002 = vpow2.f32 %v1229_v11 }
 0x494   : > { %v1987_v18 = vpop.eup %1986  ;;  %v1242_v19 = vadd.f32 1.0, %v1985_v16  ;;  %2004 = vpow2.f32 %v1227_v14 }
 0x495   : > { %v1989_v20 = vpop.eup %1988  ;;  %1284 = vst [vmem:[%s2225_s6 + $0x28] sm:$0xff] %v1987_v18  ;;  %2006 = vrcp.f32 %v1239_v17 }
 0x496   : > { %v1991_v21 = vpop.eup %1990  ;;  %1283 = vst [vmem:[%s2225_s6 + $0x20] sm:$0xff] %v1989_v20  ;;  %2008 = vrcp.f32 %v1242_v19 }
 0x497   : > { %v1993_v22 = vpop.eup %1992  ;;  %v1241_v23 = vadd.f32 1.0, %v1991_v21 }
 0x498   : > { %v1995_v24 = vpop.eup %1994  ;;  %v1244_v25 = vadd.f32 1.0, %v1993_v22 }
 0x499   : > { %v1997_v26 = vpop.eup %1996  ;;  %1286 = vst [vmem:[%s2225_s6 + $0x38] sm:$0xff] %v1995_v24  ;;  %2010 = vrcp.f32 %v1241_v23 }
 0x49a   : > { %2012 = vrcp.f32 %v1244_v25  ;;  %v1243_v27 = vadd.f32 1.0, %v1997_v26 }
 0x49b   : > { %v1999_v28 = vpop.eup %1998 }
 0x49c   : > { %v2001_v29 = vpop.eup %2000  ;;  %1285 = vst [vmem:[%s2225_s6 + $0x30] sm:$0xff] %v1999_v28  ;;  %2014 = vrcp.f32 %v1243_v27 }
 0x49d   : > { %v2003_v30 = vpop.eup %2002  ;;  %1288 = vst [vmem:[%s2225_s6 + $0x48] sm:$0xff] %v2001_v29 }
 0x49e   : > { %v2005_v31 = vpop.eup %2004  ;;  %v1246_v32 = vadd.f32 1.0, %v2003_v30 }
 0x49f   : > { %v2007_v33 = vpop.eup %2006  ;;  %v1245_v34 = vadd.f32 1.0, %v2005_v31 }
 0x4a0   : > { %v2009_v35 = vpop.eup %2008  ;;  %1287 = vst [vmem:[%s2225_s6 + $0x40] sm:$0xff] %v2007_v33  ;;  %2016 = vrcp.f32 %v1246_v32 }
 0x4a1   : > { %1290 = vst [vmem:[%s2225_s6 + $0x58] sm:$0xff] %v2009_v35  ;;  %2018 = vrcp.f32 %v1245_v34 }
 0x4a3   : > { %v2011_v36 = vpop.eup %2010 }
 0x4a4   : > { %v2013_v37 = vpop.eup %2012  ;;  %1289 = vst [vmem:[%s2225_s6 + $0x50] sm:$0xff] %v2011_v36 }
 0x4a5   : > { %1292 = vst [vmem:[%s2225_s6 + $0x68] sm:$0xff] %v2013_v37 }
 0x4a6   : > { %v2015_v38 = vpop.eup %2014 }
 0x4a7   : > { %1291 = vst [vmem:[%s2225_s6 + $0x60] sm:$0xff] %v2015_v38 }
 0x4aa   : > { %v2017_v39 = vpop.eup %2016 }
 0x4ab   : > { %v2019_v40 = vpop.eup %2018  ;;  %1294 = vst [vmem:[%s2225_s6 + $0x78] sm:$0xff] %v2017_v39 }
 0x4ac   : > { %1293 = vst [vmem:[%s2225_s6 + $0x70] sm:$0xff] %v2019_v40 }
 0x4ad PF: > { %s15_s15 = sadd.s32 1, %s2058_s15  }
 0x4ae   : > { %p12_p3 = scmp.ge.s32.totalorder %s15_s15, 4  }
 0x4b0   :  { %14 = sbr.rel (!%p12_p3) target bundleno = 1 (0x1), region = 78 }
 0x4b7   :  { %1317 = vsyncpa [#allocation3], 1 }
 0x4b8   :  { %1319 = vsyncpa [#allocation3 + $0x1], 1 }

</bundles_post_ra>
